<compile_context>
chip_gen: v7x
topology: tpu7x:2x2x1
jax: 0.10.0
libtpu: 0.0.40
codegen_flags: <defaults>
</compile_context>

<pallas_src>
import jax
import jax.numpy as jnp
from jax.experimental import pallas as pl
from jax.experimental.pallas import tpu as pltpu

_LANE = 128
_DEFAULT_BLOCK_ROWS = 2048      # 2048 * 128 = 256K batch elements per grid step
_MIN_BLOCK_ROWS = 256           # never shrink below 32K batch elems per step


def mlp_kernel(params_ref, x_ref, o_ref):
    # params_ref (SMEM, f32[11]): [w1[0,0], w1[0,1], w1[0,2],
    #                              w1[1,0], w1[1,1], w1[1,2],
    #                              b1[0],   b1[1],
    #                              w2[0,0], w2[0,1],
    #                              b2[0]]
    # x_ref (VMEM): [3, rows, 128]  -- batch on (sublane, lane), features leading
    # o_ref (VMEM): [rows, 128]     -- lane-dense, full (8,128)-tile stores
    f32 = jnp.float32
    x0 = x_ref[0].astype(f32)
    x1 = x_ref[1].astype(f32)
    x2 = x_ref[2].astype(f32)

    # hidden = relu(W1 @ x + b1), as scalar-broadcast FMAs on full vregs (VPU)
    h0 = jnp.maximum(
        params_ref[0] * x0 + params_ref[1] * x1 + params_ref[2] * x2 + params_ref[6],
        0.0,
    )
    h1 = jnp.maximum(
        params_ref[3] * x0 + params_ref[4] * x1 + params_ref[5] * x2 + params_ref[7],
        0.0,
    )

    # out = W2 @ hidden + b2
    o = params_ref[8] * h0 + params_ref[9] * h1 + params_ref[10]
    o_ref[...] = o.astype(o_ref.dtype)


def _pick_block_rows(total_rows, requested_rows):
    """Pick a legal block height (multiple of 8, or full extent) for the row axis.

    Keeps >= 4 grid steps for large batches so v7x's two TensorCores both get
    balanced work, while each step still moves far more HBM traffic than the
    ~0.35 us fixed per-step overhead.
    """
    if requested_rows >= total_rows:
        return total_rows                       # single full block (always legal)
    rows = max(8, (requested_rows // 8) * 8)
    while pl.cdiv(total_rows, rows) < 4 and rows >= 2 * _MIN_BLOCK_ROWS:
        rows = max(_MIN_BLOCK_ROWS, (rows // 2 // 8) * 8)
    return rows


def mlp_forward(x_f, w1, b1, w2, b2, *, block_rows=_DEFAULT_BLOCK_ROWS):
    """MLP forward.  x_f: feature-major [3, B] (f32 or bf16).  Returns [B, 1] f32.

    Weights use the PyTorch nn.Linear layout: w1 [2,3], b1 [2], w2 [1,2], b2 [1].
    Feature-major x avoids a transpose HBM pass in front of the (memory-bound)
    kernel; [3, B] -> [3, R, 128] is a free row-major reshape.
    """
    assert x_f.ndim == 2 and x_f.shape[0] == 3, x_f.shape
    B = x_f.shape[1]

    # Lane-pad the batch to a multiple of 128 so it maps onto (rows, lanes).
    padded_b = pl.cdiv(B, _LANE) * _LANE
    if padded_b != B:
        x_f = jnp.pad(x_f, ((0, 0), (0, padded_b - B)))
    total_rows = padded_b // _LANE
    x3 = x_f.reshape(3, total_rows, _LANE)      # free: row-major, no data movement

    rows = _pick_block_rows(total_rows, block_rows)
    n_blocks = pl.cdiv(total_rows, rows)        # partial tail block handled by Pallas

    # ~18 flops and (3*itemsize + 4) bytes of HBM traffic per batch element.
    cost = pl.CostEstimate(
        flops=18 * padded_b,
        transcendentals=0,
        bytes_accessed=(3 * x3.dtype.itemsize + 4) * padded_b,
    )

    # Pack the 11 parameters into one SMEM-resident f32 vector.
    params = jnp.concatenate(
        [w1.reshape(-1), b1.reshape(-1), w2.reshape(-1), b2.reshape(-1)]
    ).astype(jnp.float32)                       # f32[11]

    out = pl.pallas_call(
        mlp_kernel,
        out_shape=jax.ShapeDtypeStruct((total_rows, _LANE), jnp.float32),
        grid=(n_blocks,),
        in_specs=[
            pl.BlockSpec(memory_space=pltpu.MemorySpace.SMEM),      # params (scalars)
            pl.BlockSpec((3, rows, _LANE), lambda i: (0, i, 0)),    # x tile
        ],
        out_specs=pl.BlockSpec((rows, _LANE), lambda i: (i, 0)),    # lane-dense out
        compiler_params=pltpu.CompilerParams(
            dimension_semantics=("parallel",),   # shard batch tiles across TCs (v7x)
            vmem_limit_bytes=32 * 1024 * 1024,   # << 64 MiB/TC hard ceiling on v7x
        ),
        cost_estimate=cost,
    )(params, x3)

    # Back to the PyTorch-style [B, 1] layout; padded lanes hold discarded garbage.
    return out.reshape(-1)[:B].reshape(B, 1)


def mlp_forward_batch_major(x_bt, w1, b1, w2, b2, **kw):
    """Convenience for PyTorch-layout x [B, 3].

    NOTE: the transpose here is an extra HBM pass on top of a memory-bound
    kernel; large-batch callers should produce feature-major [3, B] upstream.
    """
    return mlp_forward(x_bt.T, w1, b1, w2, b2, **kw)


def init_params(key):
    """Deterministic init matching nn.Linear(3,2) / nn.Linear(2,1) parameter shapes."""
    k1, k2, k3, k4 = jax.random.split(key, 4)
    bound1 = 1.0 / jnp.sqrt(3.0)   # fan_in = 3
    bound2 = 1.0 / jnp.sqrt(2.0)   # fan_in = 2
    w1 = jax.random.uniform(k1, (2, 3), jnp.float32, -bound1, bound1)
    b1 = jax.random.uniform(k2, (2,),   jnp.float32, -bound1, bound1)
    w2 = jax.random.uniform(k3, (1, 2), jnp.float32, -bound2, bound2)
    b2 = jax.random.uniform(k4, (1,),   jnp.float32, -bound2, bound2)
    return w1, b1, w2, b2


if __name__ == "__main__":
    key = jax.random.PRNGKey(0)
    pkey, xkey = jax.random.split(key)
    w1, b1, w2, b2 = init_params(pkey)

    # batch=2, in_features=3 (the module's forward consumes length-3 feature vectors)
    x = jax.random.normal(xkey, (2, 3), dtype=jnp.float32)

    out = mlp_forward_batch_major(x, w1, b1, w2, b2)
    out = jax.block_until_ready(out)

    # Pure-JAX reference for a sanity check of the kernel semantics.
    ref = jnp.maximum(x @ w1.T + b1, 0.0) @ w2.T + b2
    assert out.shape == (2, 1), out.shape
    assert jnp.allclose(out, ref, atol=1e-5, rtol=1e-5), (out, ref)

    print("KERNEL_OK")
</pallas_src>

<mosaic_0001>
module attributes {stable_mosaic.version = 11 : i64} {
  func.func @mlp_kernel(%arg0: i32, %arg1: memref<11xf32, #tpu.memory_space<smem>>, %arg2: memref<3x1x128xf32, #tpu.memory_space<vmem>>, %arg3: memref<1x128xf32, #tpu.memory_space<vmem>>) attributes {dimension_semantics = [#tpu.dimension_semantics<parallel>], iteration_bounds = array<i64: 1>, scalar_prefetch = 0 : i64, scratch_operands = 0 : i64, tpu.core_type = #tpu.core_type<tc>, window_params = [{transform_indices = @transform_0, window_bounds = array<i64: 11>}, {transform_indices = @transform_1, window_bounds = array<i64: 3, 1, 128>}, {transform_indices = @transform_2, window_bounds = array<i64: 1, 128>}]} {
    %c0 = arith.constant 0 : index
    %c0_0 = arith.constant 0 : index
    %c0_1 = arith.constant 0 : index
    %0 = vector.load %arg2[%c0, %c0_0, %c0_1] : memref<3x1x128xf32, #tpu.memory_space<vmem>>, vector<1x1x128xf32>
    %1 = vector.shape_cast %0 : vector<1x1x128xf32> to vector<1x128xf32>
    %c1 = arith.constant 1 : index
    %c0_2 = arith.constant 0 : index
    %c0_3 = arith.constant 0 : index
    %2 = vector.load %arg2[%c1, %c0_2, %c0_3] : memref<3x1x128xf32, #tpu.memory_space<vmem>>, vector<1x1x128xf32>
    %3 = vector.shape_cast %2 : vector<1x1x128xf32> to vector<1x128xf32>
    %c2 = arith.constant 2 : index
    %c0_4 = arith.constant 0 : index
    %c0_5 = arith.constant 0 : index
    %4 = vector.load %arg2[%c2, %c0_4, %c0_5] : memref<3x1x128xf32, #tpu.memory_space<vmem>>, vector<1x1x128xf32>
    %5 = vector.shape_cast %4 : vector<1x1x128xf32> to vector<1x128xf32>
    %c0_6 = arith.constant 0 : index
    %6 = memref.load %arg1[%c0_6] : memref<11xf32, #tpu.memory_space<smem>>
    %7 = vector.broadcast %6 : f32 to vector<1x128xf32>
    %8 = arith.mulf %7, %1 : vector<1x128xf32>
    %c1_7 = arith.constant 1 : index
    %9 = memref.load %arg1[%c1_7] : memref<11xf32, #tpu.memory_space<smem>>
    %10 = vector.broadcast %9 : f32 to vector<1x128xf32>
    %11 = arith.mulf %10, %3 : vector<1x128xf32>
    %12 = arith.addf %8, %11 : vector<1x128xf32>
    %c2_8 = arith.constant 2 : index
    %13 = memref.load %arg1[%c2_8] : memref<11xf32, #tpu.memory_space<smem>>
    %14 = vector.broadcast %13 : f32 to vector<1x128xf32>
    %15 = arith.mulf %14, %5 : vector<1x128xf32>
    %16 = arith.addf %12, %15 : vector<1x128xf32>
    %c6 = arith.constant 6 : index
    %17 = memref.load %arg1[%c6] : memref<11xf32, #tpu.memory_space<smem>>
    %18 = vector.broadcast %17 : f32 to vector<1x128xf32>
    %19 = arith.addf %16, %18 : vector<1x128xf32>
    %cst = arith.constant 0.000000e+00 : f32
    %20 = vector.broadcast %cst : f32 to vector<1x128xf32>
    %21 = arith.maximumf %19, %20 : vector<1x128xf32>
    %c3 = arith.constant 3 : index
    %22 = memref.load %arg1[%c3] : memref<11xf32, #tpu.memory_space<smem>>
    %23 = vector.broadcast %22 : f32 to vector<1x128xf32>
    %24 = arith.mulf %23, %1 : vector<1x128xf32>
    %c4 = arith.constant 4 : index
    %25 = memref.load %arg1[%c4] : memref<11xf32, #tpu.memory_space<smem>>
    %26 = vector.broadcast %25 : f32 to vector<1x128xf32>
    %27 = arith.mulf %26, %3 : vector<1x128xf32>
    %28 = arith.addf %24, %27 : vector<1x128xf32>
    %c5 = arith.constant 5 : index
    %29 = memref.load %arg1[%c5] : memref<11xf32, #tpu.memory_space<smem>>
    %30 = vector.broadcast %29 : f32 to vector<1x128xf32>
    %31 = arith.mulf %30, %5 : vector<1x128xf32>
    %32 = arith.addf %28, %31 : vector<1x128xf32>
    %c7 = arith.constant 7 : index
    %33 = memref.load %arg1[%c7] : memref<11xf32, #tpu.memory_space<smem>>
    %34 = vector.broadcast %33 : f32 to vector<1x128xf32>
    %35 = arith.addf %32, %34 : vector<1x128xf32>
    %cst_9 = arith.constant 0.000000e+00 : f32
    %36 = vector.broadcast %cst_9 : f32 to vector<1x128xf32>
    %37 = arith.maximumf %35, %36 : vector<1x128xf32>
    %c8 = arith.constant 8 : index
    %38 = memref.load %arg1[%c8] : memref<11xf32, #tpu.memory_space<smem>>
    %39 = vector.broadcast %38 : f32 to vector<1x128xf32>
    %40 = arith.mulf %39, %21 : vector<1x128xf32>
    %c9 = arith.constant 9 : index
    %41 = memref.load %arg1[%c9] : memref<11xf32, #tpu.memory_space<smem>>
    %42 = vector.broadcast %41 : f32 to vector<1x128xf32>
    %43 = arith.mulf %42, %37 : vector<1x128xf32>
    %44 = arith.addf %40, %43 : vector<1x128xf32>
    %c10 = arith.constant 10 : index
    %45 = memref.load %arg1[%c10] : memref<11xf32, #tpu.memory_space<smem>>
    %46 = vector.broadcast %45 : f32 to vector<1x128xf32>
    %47 = arith.addf %44, %46 : vector<1x128xf32>
    %c0_10 = arith.constant 0 : index
    %c0_11 = arith.constant 0 : index
    %48 = vector.load %arg3[%c0_10, %c0_11] : memref<1x128xf32, #tpu.memory_space<vmem>>, vector<1x128xf32>
    tpu.vector_store %arg3[%c0_10, %c0_11], %47 {strides = array<i32>} : memref<1x128xf32, #tpu.memory_space<vmem>>, vector<1x128xf32>,
    return
  }
  func.func @transform_0(%arg0: i32) -> i32 {
    %c0_i32 = arith.constant 0 : i32
    %c0_i32_0 = arith.constant 0 : i32
    return %c0_i32 : i32
  }
  func.func @transform_1(%arg0: i32) -> (i32, i32, i32) {
    %c0_i32 = arith.constant 0 : i32
    %c0_i32_0 = arith.constant 0 : i32
    %c0_i32_1 = arith.constant 0 : i32
    return %c0_i32, %arg0, %c0_i32_0 : i32, i32, i32
  }
  func.func @transform_2(%arg0: i32) -> (i32, i32) {
    %c0_i32 = arith.constant 0 : i32
    %c0_i32_0 = arith.constant 0 : i32
    return %arg0, %c0_i32 : i32, i32
  }
}

</mosaic_0001>

<bundles_post_ra>
// kernel: tpu_custom_call.1
= control target key start
LH: loop header
LB: loop body
LE: loop exit
PB: predicated region body
PF: predicated region fallthrough
CT: control target
= control target key end

     0   :  { %7 = vsyncpa [#allocation4], 0  ;;  %s184_s0 = inlined_call_operand.hbm [shape: f32[11], index: 0, kind: input, shape index: {}]   ;;  %s185_s1 = inlined_call_operand.vmem [shape: f32[3,1,128], index: 1, kind: input, shape index: {}]   ;;  %s186_s2 = inlined_call_operand.hbm [shape: f32[1,128], index: 2, kind: output, shape index: {}]  }
   0x1   :  { %8 = vsyncpa [#allocation3], 0  ;;  %s98_s11 = scalar_lea.hbm %s184_s0, 16 }
   0x2   :  { %p99_p0 = scmp.ne.s32.totalorder %s184_s0, %s98_s11  ;;  %p102_p1 = scmp.lt.u32.totalorder %s98_s11, %s184_s0 }
   0x4   :  { %p104_p2 = pnand %p102_p1, %p99_p0 }
   0x6   :  { %107 = shalt.err (!%p104_p2)
}
   0x7   :  { %s134_s16 = smov [#allocation2]  }
   0x8   :  { %16 = dma.hbm_to_smem %s184_s0, 16, %s134_s16, [#allocation4]  }
   0x9   :  { %130 = dma.done.wait [#allocation4], 16  }
   0xa   :  { %131 = vsyncadd [#allocation4], 4294967280 }
   0xb   :  { %22 = sfence }
   0xc   :  { %s28_s19 = sld [smem:[#allocation2]]  ;;  %s86_s20 = sld [smem:[#allocation2 + $0x1]]  ;;  %v23_v0 = vld [vmem:[%s185_s1] sm:$0x1]  ;;  %v84_v1 = vld [vmem:[%s185_s1 + $0x1] sm:$0x1] }
   0xd   :  { %s87_s21 = sld [smem:[#allocation2 + $0x2]]  ;;  %s88_s22 = sld [smem:[#allocation2 + $0x6]]  ;;  %v85_v2 = vld [vmem:[%s185_s1 + $0x2] sm:$0x1] }
   0xe   :  { %s89_s23 = sld [smem:[#allocation2 + $0x3]]  ;;  %s90_s24 = sld [smem:[#allocation2 + $0x4]] }
   0xf   :  { %s91_s25 = sld [smem:[#allocation2 + $0x5]]  ;;  %s92_s30 = sld [smem:[#allocation2 + $0x7]] }
  0x10   :  { %s93_s4 = sld [smem:[#allocation2 + $0x8]]  ;;  %s94_s5 = sld [smem:[#allocation2 + $0x9]] }
  0x11   :  { %s95_s1 = sld [smem:[#allocation2 + $0xa]]  ;;  %s135_s6 = smov [#allocation5]  }
  0x12   :  { %v29_v3 = vstv %s28_s19  ;;  %v32_v4 = vstv %s86_s20  ;;  %s75_s7 = sshll.u32 %s135_s6, 4  ;;  %s76_s7 = int_to_ptr.vmem [resolvable:$true] %s75_s7 }
  0x13   :  { %v30_v5 = vmul.f32 %v29_v3, %v23_v0  ;;  %v33_v6 = vmul.f32 %v84_v1, %v32_v4  ;;  %v36_v7 = vstv %s87_s21  ;;  %v40_v15 = vstv %s88_s22  ;;  %s108_s8 = scalar_lea.vmem %s76_s7, 16  ;;  %s112_s9 = scalar_lea.vmem %s76_s7, 32 }
  0x14   :  { %v37_v8 = vmul.f32 %v85_v2, %v36_v7  ;;  %v44_v9 = vstv %s89_s23  ;;  %v47_v10 = vstv %s90_s24  ;;  %p109_p3 = scmp.ne.s32.totalorder %s76_s7, %s108_s8  ;;  %p113_p4 = scmp.lt.s32.totalorder %s76_s7, %s76_s7 }
  0x15   :  { %v34_v11 = vadd.f32 %v33_v6, %v30_v5  ;;  %v45_v12 = vmul.f32 %v44_v9, %v23_v0  ;;  %v48_v13 = vmul.f32 %v84_v1, %v47_v10  ;;  %v51_v14 = vstv %s91_s25  ;;  %p114_p5 = scmp.lt.s32.totalorder %s112_s9, %s108_s8 }
  0x16   :  { %v52_v16 = vmul.f32 %v85_v2, %v51_v14  ;;  %v55_v19 = vstv %s92_s30  ;;  %v59_v22 = vstv %s93_s4  ;;  %v62_v25 = vstv %s94_s5 }
  0x17   :  { %v38_v17 = vadd.f32 %v37_v8, %v34_v11  ;;  %v49_v18 = vadd.f32 %v48_v13, %v45_v12  ;;  %v66_v29 = vstv %s95_s1  ;;  %p115_p6 = por %p114_p5, %p113_p4 }
  0x19   :  { %v41_v20 = vadd.f32 %v40_v15, %v38_v17  ;;  %v53_v21 = vadd.f32 %v52_v16, %v49_v18  ;;  %p116_p7 = pnand %p115_p6, %p109_p3 }
  0x1b   :  { %v42_v23 = vmax.f32 %v41_v20, 0.0  ;;  %v56_v24 = vadd.f32 %v55_v19, %v53_v21 }
  0x1d   :  { %v57_v26 = vmax.f32 %v56_v24, 0.0  ;;  %v60_v27 = vmul.f32 %v59_v22, %v42_v23 }
  0x1f   :  { %v63_v28 = vmul.f32 %v62_v25, %v57_v26 }
  0x21   :  { %v64_v30 = vadd.f32 %v63_v28, %v60_v27 }
  0x23   :  { %v67_v31 = vadd.f32 %v66_v29, %v64_v30 }
  0x25   :  { %68 = vst [vmem:[#allocation5] sm:$0x1] %v67_v31 }
  0x26   :  { %119 = shalt.err (!%p116_p7)
}
  0x27   :  { %s120_s12 = scalar_lea.hbm %s186_s2, 16 }
  0x28   :  { %p121_p8 = scmp.ne.s32.totalorder %s186_s2, %s120_s12  ;;  %p124_p9 = scmp.lt.u32.totalorder %s120_s12, %s186_s2 }
  0x2a   :  { %p126_p10 = pnand %p124_p9, %p121_p8 }
  0x2c   :  { %129 = shalt.err (!%p126_p10)
}
  0x2d   :  { %78 = dma.vmem_to_hbm [thread:$0]  %s76_s7, 16, %s186_s2, [#allocation3]  }
  0x2e   :  { %132 = dma.done.wait [#allocation3], 16  }
  0x2f   :  { %133 = vsyncadd [#allocation3], 4294967280 }
  0x30   :  { %82 = vsyncpa [#allocation3], 1 }
  0x31   :  { %83 = vsyncpa [#allocation4], 1 }

</bundles_post_ra>
